<compile_context>
chip_gen: v6e
topology: v6e:2x2x1
jax: 0.10.0
libtpu: 0.0.40
codegen_flags: <defaults>
</compile_context>

<pallas_src>
import functools

import jax
import jax.numpy as jnp
from jax import lax
from jax.experimental import pallas as pl
from jax.experimental.pallas import tpu as pltpu


def _round_up(x, m):
    return ((x + m - 1) // m) * m


def _samplenet_kernel(outwn_ref, u_ref, probs_ref, ind_ref,
                      *, inv_temperature, n_class, tile_s):
    # Lane-dense layout: (n_class, tile_s) tiles -- samples along lanes,
    # classes along sublanes.
    eps = 1e-20
    u = u_ref[...]                                    # (n_class, tile_s) in [0, 1)
    g = -jnp.log(-jnp.log(u + eps) + eps)             # Gumbel noise (EUP)
    z = (outwn_ref[...] + g) * inv_temperature        # logits broadcast over lanes

    # argmax over the class (sublane) axis; min-index tie-break.
    row = lax.broadcasted_iota(jnp.int32, (n_class, tile_s), 0)
    z_max = jnp.max(z, axis=0, keepdims=True)         # (1, tile_s)
    ind_ref[...] = jnp.min(jnp.where(z == z_max, row, n_class),
                           axis=0, keepdims=True)     # (1, tile_s) int32

    # Stabilized softmax over the class axis -> realprob (y).
    e = jnp.exp(z - z_max)
    denom = jnp.sum(e, axis=0, keepdims=True)         # (1, tile_s)
    probs_ref[...] = e / denom


def init_outwn(augpool, origininit=1):
    """Deterministic parameter init mirroring SampleNet.__init__ (origininit=1)."""
    if origininit == 0:
        return jnp.zeros((augpool,), jnp.float32)
    alphas_origin = jnp.ones((1,), jnp.float32)
    alphas_augment = jnp.log(jnp.exp(jnp.ones((augpool - 1,), jnp.float32)) /
                             jnp.float32(augpool - 1))
    return jnp.concatenate([alphas_origin, alphas_augment])


def samplenet_forward(outwn, temperature, samplenum, key, indsel=None):
    assert indsel is None, "indsel path not supported (rejection sampling loop)"
    augpool = int(outwn.shape[0])

    # Even (>=2) number of parallel grid steps (v7x megacore), <= 8192 samples
    # per step, lane-granule (128) tiles => bounded padding, few grid steps.
    n_steps = max(2, 2 * pl.cdiv(samplenum, 2 * 8192))
    tile_s = _round_up(pl.cdiv(samplenum, n_steps), 128)
    s_pad = tile_s * n_steps

    # Uniform noise generated in the (class, sample) layout the kernel consumes.
    # NOTE: random stream differs from torch.rand -- fine for a sampler.
    u = jax.random.uniform(key, (augpool, s_pad), jnp.float32)
    outwn2d = outwn.reshape(augpool, 1).astype(jnp.float32)

    kernel = functools.partial(
        _samplenet_kernel,
        inv_temperature=1.0 / float(temperature),
        n_class=augpool,
        tile_s=tile_s,
    )

    probs_t, ind_row = pl.pallas_call(
        kernel,
        out_shape=(
            jax.ShapeDtypeStruct((augpool, s_pad), jnp.float32),  # realprob^T
            jax.ShapeDtypeStruct((1, s_pad), jnp.int32),          # ind (lane-dense)
        ),
        grid=(n_steps,),
        in_specs=[
            pl.BlockSpec((augpool, 1), lambda i: (0, 0)),         # logits (resident)
            pl.BlockSpec((augpool, tile_s), lambda i: (0, i)),    # uniform noise
        ],
        out_specs=(
            pl.BlockSpec((augpool, tile_s), lambda i: (0, i)),
            pl.BlockSpec((1, tile_s), lambda i: (0, i)),
        ),
        compiler_params=pltpu.CompilerParams(
            dimension_semantics=("parallel",),
        ),
    )(outwn2d, u)

    # Wrapper-side layout plumbing back to the module's (samplenum, augpool) view.
    realprob = probs_t[:, :samplenum].T
    ind = ind_row[0, :samplenum]
    # Straight-through forward value output[k, ind[k]] is identically 1.0
    # (one-hot gathered at its own argmax) -- no kernel work needed.
    outputsel = jnp.ones((samplenum,), jnp.float32)
    return outputsel, ind, realprob


def _check(outputsel, ind, realprob, samplenum, augpool):
    assert realprob.shape == (samplenum, augpool)
    assert ind.shape == (samplenum,)
    assert outputsel.shape == (samplenum,)
    assert bool(jnp.allclose(jnp.sum(realprob, axis=-1), 1.0, atol=1e-5))
    rows = jnp.arange(samplenum)
    assert bool(jnp.all(realprob[rows, ind] == jnp.max(realprob, axis=-1)))
    assert bool(jnp.allclose(outputsel, 1.0))


if __name__ == "__main__":
    augpool = 16
    temperature = 0.5
    outwn = init_outwn(augpool, origininit=1)

    key = jax.random.PRNGKey(0)
    k1, k2 = jax.random.split(key)

    # Small demo size (minimum even grid, padded columns sliced off).
    samplenum = 8
    outputsel, ind, realprob = samplenet_forward(outwn, temperature, samplenum, k1)
    jax.block_until_ready((outputsel, ind, realprob))
    _check(outputsel, ind, realprob, samplenum, augpool)

    # Multi-tile path (exercises grid + padding slice-off + transpose back).
    samplenum2 = 2000
    outputsel2, ind2, realprob2 = samplenet_forward(outwn, temperature, samplenum2, k2)
    jax.block_until_ready((outputsel2, ind2, realprob2))
    _check(outputsel2, ind2, realprob2, samplenum2, augpool)

    print("KERNEL_OK")
</pallas_src>

<mosaic_0001>
module attributes {stable_mosaic.version = 11 : i64} {
  func.func @_samplenet_kernel(%arg0: i32, %arg1: memref<16x1xf32, #tpu.memory_space<vmem>>, %arg2: memref<16x128xf32, #tpu.memory_space<vmem>>, %arg3: memref<16x128xf32, #tpu.memory_space<vmem>>, %arg4: memref<1x128xi32, #tpu.memory_space<vmem>>) attributes {dimension_semantics = [#tpu.dimension_semantics<parallel>], iteration_bounds = array<i64: 2>, scalar_prefetch = 0 : i64, scratch_operands = 0 : i64, tpu.core_type = #tpu.core_type<tc>, window_params = [{pipeline_mode = #tpu.pipeline_mode<synchronous>, transform_indices = @transform_0, window_bounds = array<i64: 16, 1>}, {transform_indices = @transform_1, window_bounds = array<i64: 16, 128>}, {transform_indices = @transform_2, window_bounds = array<i64: 16, 128>}, {transform_indices = @transform_3, window_bounds = array<i64: 1, 128>}]} {
    %c0 = arith.constant 0 : index
    %c0_0 = arith.constant 0 : index
    %0 = vector.load %arg2[%c0, %c0_0] : memref<16x128xf32, #tpu.memory_space<vmem>>, vector<16x128xf32>
    %cst = arith.constant 9.99999968E-21 : f32
    %1 = vector.broadcast %cst : f32 to vector<16x128xf32>
    %2 = arith.addf %0, %1 : vector<16x128xf32>
    %3 = math.log %2 : vector<16x128xf32>
    %cst_1 = arith.constant 0.000000e+00 : f32
    %4 = vector.broadcast %cst_1 : f32 to vector<16x128xf32>
    %5 = arith.subf %4, %3 : vector<16x128xf32>
    %cst_2 = arith.constant 9.99999968E-21 : f32
    %6 = vector.broadcast %cst_2 : f32 to vector<16x128xf32>
    %7 = arith.addf %5, %6 : vector<16x128xf32>
    %8 = math.log %7 : vector<16x128xf32>
    %cst_3 = arith.constant 0.000000e+00 : f32
    %9 = vector.broadcast %cst_3 : f32 to vector<16x128xf32>
    %10 = arith.subf %9, %8 : vector<16x128xf32>
    %c0_4 = arith.constant 0 : index
    %c0_5 = arith.constant 0 : index
    %11 = vector.load %arg1[%c0_4, %c0_5] : memref<16x1xf32, #tpu.memory_space<vmem>>, vector<16x1xf32>
    %12 = vector.broadcast %11 : vector<16x1xf32> to vector<16x128xf32>
    %13 = arith.addf %12, %10 : vector<16x128xf32>
    %cst_6 = arith.constant 2.000000e+00 : f32
    %14 = vector.broadcast %cst_6 : f32 to vector<16x128xf32>
    %15 = arith.mulf %13, %14 : vector<16x128xf32>
    %16 = tpu.iota {dimensions = array<i32: 0>} : vector<16x128xi32>
    %cst_7 = arith.constant dense<0xFF800000> : vector<128xf32>
    %17 = vector.multi_reduction <maximumf>, %15, %cst_7 [0] : vector<16x128xf32> to vector<128xf32>
    %18 = vector.shape_cast %17 : vector<128xf32> to vector<1x128xf32>
    %19 = vector.broadcast %18 : vector<1x128xf32> to vector<16x128xf32>
    %20 = arith.cmpf oeq, %15, %19 : vector<16x128xf32>
    %c16_i32 = arith.constant 16 : i32
    %21 = vector.broadcast %c16_i32 : i32 to vector<16x128xi32>
    %22 = arith.select %20, %16, %21 : vector<16x128xi1>, vector<16x128xi32>
    %cst_8 = arith.constant dense<2147483647> : vector<128xi32>
    %23 = vector.multi_reduction <minsi>, %22, %cst_8 [0] : vector<16x128xi32> to vector<128xi32>
    %24 = vector.shape_cast %23 : vector<128xi32> to vector<1x128xi32>
    %c0_9 = arith.constant 0 : index
    %c0_10 = arith.constant 0 : index
    %25 = vector.load %arg4[%c0_9, %c0_10] : memref<1x128xi32, #tpu.memory_space<vmem>>, vector<1x128xi32>
    tpu.vector_store %arg4[%c0_9, %c0_10], %24 {strides = array<i32>} : memref<1x128xi32, #tpu.memory_space<vmem>>, vector<1x128xi32>,
    %26 = vector.broadcast %18 : vector<1x128xf32> to vector<16x128xf32>
    %27 = arith.subf %15, %26 : vector<16x128xf32>
    %28 = math.exp %27 : vector<16x128xf32>
    %cst_11 = arith.constant dense<0.000000e+00> : vector<128xf32>
    %29 = vector.multi_reduction <add>, %28, %cst_11 [0] : vector<16x128xf32> to vector<128xf32>
    %30 = vector.shape_cast %29 : vector<128xf32> to vector<1x128xf32>
    %31 = vector.broadcast %30 : vector<1x128xf32> to vector<16x128xf32>
    %32 = arith.divf %28, %31 : vector<16x128xf32>
    %c0_12 = arith.constant 0 : index
    %c0_13 = arith.constant 0 : index
    %33 = vector.load %arg3[%c0_12, %c0_13] : memref<16x128xf32, #tpu.memory_space<vmem>>, vector<16x128xf32>
    tpu.vector_store %arg3[%c0_12, %c0_13], %32 {strides = array<i32>} : memref<16x128xf32, #tpu.memory_space<vmem>>, vector<16x128xf32>,
    return
  }
  func.func @transform_0(%arg0: i32) -> (i32, i32) {
    %c0_i32 = arith.constant 0 : i32
    %c0_i32_0 = arith.constant 0 : i32
    %c0_i32_1 = arith.constant 0 : i32
    return %c0_i32, %c0_i32_0 : i32, i32
  }
  func.func @transform_1(%arg0: i32) -> (i32, i32) {
    %c0_i32 = arith.constant 0 : i32
    %c0_i32_0 = arith.constant 0 : i32
    return %c0_i32, %arg0 : i32, i32
  }
  func.func @transform_2(%arg0: i32) -> (i32, i32) {
    %c0_i32 = arith.constant 0 : i32
    %c0_i32_0 = arith.constant 0 : i32
    return %c0_i32, %arg0 : i32, i32
  }
  func.func @transform_3(%arg0: i32) -> (i32, i32) {
    %c0_i32 = arith.constant 0 : i32
    %c0_i32_0 = arith.constant 0 : i32
    return %c0_i32, %arg0 : i32, i32
  }
}

</mosaic_0001>

<bundles_post_ra>
// kernel: tpu_custom_call.1
= control target key start
LH: loop header
LB: loop body
LE: loop exit
PB: predicated region body
PF: predicated region fallthrough
CT: control target
= control target key end

     0   :  { %9 = vsyncpa [#allocation3], 0  ;;  %s843_s0 = inlined_call_operand.vmem [shape: f32[16,1], index: 0, kind: input, shape index: {}]   ;;  %s844_s1 = inlined_call_operand.hbm [shape: f32[16,256], index: 1, kind: input, shape index: {}]   ;;  %s845_s2 = inlined_call_operand.hbm [shape: f32[16,256], index: 2, kind: output, shape index: {0}]   ;;  %s846_s3 = inlined_call_operand.hbm [shape: s32[1,256], index: 3, kind: output, shape index: {1}]  }
   0x1   :  { %11 = vsyncpa [#allocation3 + $0x1], 0 }
   0x2   :  { %12 = vsyncpa [#allocation4], 0 }
   0x3   :  { %14 = vsyncpa [#allocation4 + $0x1], 0 }
   0x4   :  { %15 = vsyncpa [#allocation7], 0 }
   0x5   :  { %17 = vsyncpa [#allocation7 + $0x1], 0  ;;  %s647_s12 = smov 0   ;;  %s649_s13 = smov 0  }
   0x6   :  { %s651_s14 = smov 0   ;;  %s653_s15 = smov 0  }
   0x7 LB: > { %s668_s16 = sadd.s32 4294967295, %s615_s15   ;;  %s407_s17 = sadd.s32 4294967294, %s615_s15   ;;  %s615_s15 = sphi %s653_s15, %s862_s15   ;;  %s611_s14 = sphi %s651_s14, %s861_s14   ;;  %s607_s13 = sphi %s649_s13, %s860_s13   ;;  %s603_s12 = sphi %s647_s12, %s859_s12  }
   0x8   : > { %s672_s18 = sadd.s32 1, %s615_s15   ;;  %s51_s19 = sadd.s32 1, %s611_s14 }
   0x9   : > { %s48_s20 = ssub.s32 %s615_s15, %s672_s18  ;;  %p58_p0 = scmp.ne.s32.totalorder %s611_s14, %s607_s13 }
   0xa   : > { %p49_p1 = scmp.eq.s32.totalorder %s48_s20, 0  ;;  %p59_p2 = scmp.eq.s32.totalorder %s615_s15, 0 }
   0xb   : > { %p64_p3 = scmp.ne.s32.totalorder %s607_s13, %s603_s12  ;;  %p65_p4 = scmp.eq.s32.totalorder %s668_s16, 0 }
   0xc   : > { %s684_s21 = scalar_select %p49_p1, %s611_s14, %s51_s19  }
   0xd   : > { %p686_p5 = por %p59_p2, %p58_p0  ;;  %p690_p6 = por %p65_p4, %p64_p3 }
   0xe   : > { %p88_p7 = scmp.eq.s32.totalorder %s668_s16, 1  ;;  %p94_p8 = scmp.eq.s32.totalorder %s407_s17, 1 }
   0xf   : > { %s850_s23 = scalar_select %p690_p6, 1, 0 }
  0x10   : > { %p437_p10 = scmp.lt.s32.totalorder %s615_s15, 2  ;;  %p697_p11 = por %p88_p7, %p58_p0 }
  0x11   : > { %p701_p12 = por %p94_p8, %p64_p3  ;;  %s143_s26 = sand.u32 1, %s611_s14  }
  0x12   : > { %s851_s24 = scalar_select %p697_p11, 1, 0 }
  0x13   : > { %s852_s25 = scalar_select %p701_p12, 1, 0 }
  0x14   : > { %s411_s27 = sshll.u32 %s615_s15, 7  ;;  %s410_s28 = sshll.u32 %s143_s26, 4 }
  0x15   : > { %s710_s4 = scalar_lea.hbm %s844_s1, %s411_s27  ;;  %s147_s5 = scalar_lea.vmem [#allocation2], %s410_s28 }
  0x16   : > { %s153_s6 = sshll.u32 %s147_s5, 4  ;;  %p714_p13 = pnand %p437_p10, %p686_p5  ;;  %s718_s6 = int_to_ptr.vmem [resolvable:$true] %s153_s6 }
  0x17   : > { %s721_s8 = scalar_lea.sflag [#allocation3], %s143_s26  ;;  %s493_s9 = scalar_lea.hbm %s710_s4, 256 }
  0x18   : > { %p494_p1 = scmp.ne.s32.totalorder %s710_s4, %s493_s9  ;;  %p495_p2 = pneg %p714_p13 }
  0x19   : > { %s498_s17 = scalar_lea.hbm %s844_s1, 512  ;;  %p499_p5 = scmp.lt.s32.totalorder %s710_s4, %s844_s1 }
  0x1a   : > { %p496_p3 = pnand %p495_p2, %p494_p1  ;;  %p500_p7 = scmp.lt.s32.totalorder %s498_s17, %s493_s9 }
  0x1c   : > { %p497_p4 = pneg %p496_p3  ;;  %p501_p8 = por %p500_p7, %p499_p5 }
  0x1e   : > { %p502_p10 = pnand %p501_p8, %p497_p4 }
  0x20   : > { %505 = shalt.err (!%p502_p10)
}
  0x21   : > { %s506_s22 = scalar_lea.vmem %s718_s6, 256  ;;  %s617_s26 = smov [#allocation2]  }
  0x22   : > { %p507_p9 = scmp.ne.s32.totalorder %s718_s6, %s506_s22  ;;  %s511_s27 = sshll.u32 %s617_s26, 4  ;;  %s512_s27 = int_to_ptr.vmem [resolvable:$false] %s511_s27 }
  0x23   : > { %s513_s28 = scalar_lea.vmem %s512_s27, 512  ;;  %p514_p3 = scmp.lt.s32.totalorder %s718_s6, %s512_s27 }
  0x24   : > { %p509_p0 = pnand %p507_p9, %p495_p2  ;;  %p515_p12 = scmp.lt.s32.totalorder %s513_s28, %s506_s22 }
  0x26   : > { %p510_p1 = pneg %p509_p0  ;;  %p516_p11 = por %p515_p12, %p514_p3 }
  0x28   : > { %p517_p6 = pnand %p516_p11, %p510_p1 }
  0x2a   : > { %520 = shalt.err (!%p517_p6)
}
  0x2b   : > { %s618_s29 = smov 256   ;;  %s619_s30 = smov 128  }
  0x2c   : > { %s620_s5 = smov 8   ;;  %p161_p9 = scmp.lt.s32.totalorder %s615_s15, 3 }
  0x2d   : > { %429 = dma.hbm_to_vmem [thread:$0]  (!%p714_p13), %s710_s4, 256, %s718_s6, %s721_s8, %s618_s29, %s619_s30, %s620_s5  }
  0x2e   : > { %p854_p0 = scmp.ge.s32.totalorder %s615_s15, 1 }
  0x30   : > { %p162_p2 = pnand %p854_p0, %p161_p9 }
  0x31   : > { %s746_s9 = sand.u32 (!%p162_p2), 1, %s607_s13   ;;  %p855_p6 = scmp.ne.s32.totalorder (!%p162_p2), %s850_s23, 0 }
  0x32   : > { %165 = sbr.rel (%p162_p2) target bundleno = 279 (0x117), region = 28  ;;  %s413_s10 = sshll.u32 (!%p162_p2), %s746_s9, 4 }
  0x33   : > { %s168_s11 = scalar_lea.sflag (!%p162_p2), [#allocation3], %s746_s9  ;;  %s171_s17 = scalar_lea.vmem (!%p162_p2), [#allocation2], %s413_s10 }
  0x37   : > { %590 = dma.done.wait (%p855_p6), %s168_s11, 256  }
  0x38   : > { %592 = vsyncadd (%p855_p6), %s168_s11, 4294967040  ;;  %v621_v0 = vmov 0   ;;  %v216_v1 = vld [vmem:[%s843_s0] sm:$0xff]  ;;  %v217_v2 = vld [vmem:[%s843_s0 + $0x8] sm:$0xff]  ;;  %v232_v29 = vlaneseq  ;;  %s417_s23 = sshll.u32 %s668_s16, 4  ;;  %s197_s19 = scalar_lea.vmem [#allocation6], %s746_s9 }
  0x39   : > { %478 = vset.pattern.permute.xlu0 %v621_v0  ;;  %v198_v3 = vld [vmem:[%s171_s17] sm:$0xff]  ;;  %v199_v4 = vld [vmem:[%s171_s17 + $0x8] sm:$0xff]  ;;  %s309_s20 = sshll.u32 %s197_s19, 4  ;;  %s767_s27 = scalar_lea.hbm %s846_s3, %s417_s23  ;;  %s769_s20 = int_to_ptr.vmem [resolvable:$true] %s309_s20 }
  0x3a   : > { %220 = vperm.xlu0 %478, %v216_v1   ;;  %v200_v5 = vadd.f32 1e-20, %v198_v3  ;;  %v201_v6 = vadd.f32 1e-20, %v199_v4  ;;  %v233_v32 = vshrl.u32 %v232_v29, 7  ;;  %s282_s28 = scalar_lea.sflag [#allocation7], %s746_s9 }
  0x3b   : > { %s521_s29 = scalar_lea.vmem %s769_s20, 16  ;;  %p856_p12 = scmp.ne.s32.totalorder %s851_s24, 0 }
  0x3c   : > { %479 = vlog2.f32 %v200_v5  ;;  %v234_v35 = vadd.s32 8, %v233_v32  ;;  %p522_p11 = scmp.ne.s32.totalorder %s769_s20, %s521_s29  ;;  %s622_s30 = smov [#allocation6]  }
  0x3d   : > { %481 = vlog2.f32 %v201_v6  ;;  %s525_s5 = sshll.u32 %s622_s30, 4  ;;  %s526_s5 = int_to_ptr.vmem [resolvable:$false] %s525_s5 }
  0x3e   : > { %225 = vperm.xlu0 %478, %v217_v2   ;;  %p523_p13 = pnand %p522_p11, %p856_p12  ;;  %s527_s11 = scalar_lea.vmem %s526_s5, 32 }
  0x3f   : > { %p528_p5 = scmp.lt.s32.totalorder %s769_s20, %s526_s5  ;;  %p529_p7 = scmp.lt.s32.totalorder %s527_s11, %s521_s29 }
  0x40   : > { %p524_p4 = pneg %p523_p13 }
  0x41   : > { %p530_p8 = por %p529_p7, %p528_p5 }
  0x43   : > { %p531_p10 = pnand %p530_p8, %p524_p4 }
  0x49   : > { %v480_v7 = vpop.eup %479 }
  0x4a   : > { %v482_v8 = vpop.eup %481  ;;  %v203_v9 = vmul.f32 0.6931472, %v480_v7 }
  0x4b   : > { %v205_v10 = vmul.f32 0.6931472, %v482_v8 }
  0x4c   : > { %v206_v11 = vsub.f32 0.0, %v203_v9 }
  0x4d   : > { %v207_v12 = vsub.f32 0.0, %v205_v10 }
  0x4e   : > { %v208_v13 = vadd.f32 1e-20, %v206_v11 }
  0x4f   : > { %v209_v14 = vadd.f32 1e-20, %v207_v12 }
  0x50   : > { %483 = vlog2.f32 %v208_v13 }
  0x51   : > { %485 = vlog2.f32 %v209_v14 }
  0x5d   : > { %v484_v15 = vpop.eup %483 }
  0x5e   : > { %v486_v16 = vpop.eup %485  ;;  %v211_v17 = vmul.f32 0.6931472, %v484_v15 }
  0x5f   : > { %v213_v18 = vmul.f32 0.6931472, %v486_v16 }
  0x60   : > { %v214_v19 = vsub.f32 0.0, %v211_v17 }
  0x61   : > { %v215_v21 = vsub.f32 0.0, %v213_v18 }
  0xb5   : > { %v221_v20 = vpop.permute.xlu0 %220 }
  0xb6   : > { %v228_v22 = vadd.f32 %v221_v20, %v214_v19 }
  0xb8   : > { %v230_v25 = vmul.f32 2.0, %v228_v22 }
  0xb9   : > { %v226_v23 = vpop.permute.xlu0 %225 }
  0xba   : > { %v229_v24 = vadd.f32 %v226_v23, %v215_v21 }
  0xbc   : > { %v231_v26 = vmul.f32 2.0, %v229_v24 }
  0xbe   : > { %v235_v27 = vmax.f32 %v230_v25, %v231_v26 }
  0xc0   : > { %v236_v28 = vrot.slane %v235_v27, 4 }
  0xc2   : > { %v237_v30 = vmax.f32 %v235_v27, %v236_v28 }
  0xc4   : > { %v238_v31 = vrot.slane %v237_v30, 2 }
  0xc6   : > { %v239_v33 = vmax.f32 %v237_v30, %v238_v31 }
  0xc8   : > { %v240_v34 = vrot.slane %v239_v33, 1 }
  0xca   : > { %v241_v36 = vmax.f32 %v239_v33, %v240_v34 }
  0xcc   : > { %vm242_vm0 = vcmp.eq.f32.partialorder %v230_v25, %v241_v36  ;;  %vm243_vm1 = vcmp.eq.f32.partialorder %v231_v26, %v241_v36  ;;  %v258_v37 = vsub.f32 %v230_v25, %v241_v36  ;;  %v259_v38 = vsub.f32 %v231_v26, %v241_v36 }
  0xcd   : > { %v244_v39 = vsel %vm242_vm0, %v233_v32, 16  ;;  %v245_v40 = vsel %vm243_vm1, %v234_v35, 16 }
  0xce   : > { %vm246_vm2 = vcmp.lt.s32.totalorder %v244_v39, %v245_v40  ;;  %v260_v41 = vmul.f32 1.442695, %v258_v37  ;;  %v262_v42 = vmul.f32 1.442695, %v259_v38 }
  0xcf   : > { %v247_v43 = vsel %vm246_vm2, %v244_v39, %v245_v40 }
  0xd0   : > { %v248_v44 = vrot.slane %v247_v43, 4  ;;  %487 = vpow2.f32 %v260_v41 }
  0xd1   : > { %489 = vpow2.f32 %v262_v42 }
  0xd2   : > { %vm249_vm3 = vcmp.lt.s32.totalorder %v247_v43, %v248_v44 }
  0xd3   : > { %v250_v45 = vsel %vm249_vm3, %v247_v43, %v248_v44 }
  0xd4   : > { %v251_v46 = vrot.slane %v250_v45, 2 }
  0xd6   : > { %vm252_vm4 = vcmp.lt.s32.totalorder %v250_v45, %v251_v46 }
  0xd7   : > { %v253_v47 = vsel %vm252_vm4, %v250_v45, %v251_v46 }
  0xd8   : > { %v254_v48 = vrot.slane %v253_v47, 1 }
  0xda   : > { %vm255_vm5 = vcmp.lt.s32.totalorder %v253_v47, %v254_v48 }
  0xdb   : > { %v256_v49 = vsel %vm255_vm5, %v253_v47, %v254_v48 }
  0xdc   : > { %257 = vst [vmem:[%s197_s19] sm:$0x1] %v256_v49 }
  0xdd   : > { %v488_v50 = vpop.eup %487 }
  0xde   : > { %534 = shalt.err (!%p531_p10)
}
  0xdf   : > { %s535_s17 = scalar_lea.hbm %s767_s27, 16  ;;  %s539_s7 = scalar_lea.hbm %s846_s3, 32 }
  0xe0   : > { %p536_p1 = scmp.ne.s32.totalorder %s767_s27, %s535_s17  ;;  %p540_p0 = scmp.lt.s32.totalorder %s767_s27, %s846_s3 }
  0xe1   : > { %p541_p2 = scmp.lt.s32.totalorder %s539_s7, %s535_s17 }
  0xe2   : > { %p537_p3 = pnand %p536_p1, %p856_p12 }
  0xe3   : > { %p542_p6 = por %p541_p2, %p540_p0 }
  0xe4   : > { %p538_p9 = pneg %p537_p3 }
  0xe6   : > { %p543_p11 = pnand %p542_p6, %p538_p9 }
  0xe8   : > { %546 = shalt.err (!%p543_p11)
}
  0xe9   : > { %423 = dma.vmem_to_hbm [thread:$0]  (%p856_p12), %s769_s20, 16, %s767_s27, %s282_s28   ;;  %v490_v51 = vpop.eup %489 }
  0xea   : > { %v264_v52 = vadd.f32 %v490_v51, %v488_v50  ;;  %s416_s19 = sshll.u32 %s668_s16, 7  ;;  %s191_s22 = scalar_lea.vmem [#allocation5], %s413_s10 }
  0xeb   : > { %s293_s26 = sshll.u32 %s191_s22, 4  ;;  %s798_s5 = scalar_lea.hbm %s845_s2, %s416_s19  ;;  %s800_s26 = int_to_ptr.vmem [resolvable:$true] %s293_s26 }
  0xec   : > { %v265_v53 = vrot.slane %v264_v52, 4  ;;  %s277_s20 = scalar_lea.sflag [#allocation4], %s746_s9  ;;  %s547_s16 = scalar_lea.vmem %s800_s26, 256 }
  0xed   : > { %p548_p13 = scmp.ne.s32.totalorder %s800_s26, %s547_s16  ;;  %s623_s10 = smov [#allocation5]  }
  0xee   : > { %v266_v54 = vadd.f32 %v265_v53, %v264_v52  ;;  %s551_s27 = sshll.u32 %s623_s10, 4  ;;  %s552_s27 = int_to_ptr.vmem [resolvable:$false] %s551_s27 }
  0xef   : > { %p549_p4 = pnand %p548_p13, %p856_p12  ;;  %s553_s28 = scalar_lea.vmem %s552_s27, 512 }
  0xf0   : > { %v267_v55 = vrot.slane %v266_v54, 2  ;;  %p554_p7 = scmp.lt.s32.totalorder %s800_s26, %s552_s27  ;;  %p555_p8 = scmp.lt.s32.totalorder %s553_s28, %s547_s16 }
  0xf1   : > { %p550_p5 = pneg %p549_p4 }
  0xf2   : > { %v268_v56 = vadd.f32 %v267_v55, %v266_v54  ;;  %p556_p10 = por %p555_p8, %p554_p7 }
  0xf4   : > { %v269_v57 = vrot.slane %v268_v56, 1  ;;  %p557_p1 = pnand %p556_p10, %p550_p5 }
  0xf6   : > { %v270_v58 = vadd.f32 %v269_v57, %v268_v56 }
  0xf8   : > { %491 = vrcp.f32 %v270_v58 }
 0x105   : > { %v492_v59 = vpop.eup %491 }
 0x106   : > { %v273_v60 = vmul.f32 %v492_v59, %v490_v51  ;;  %v272_v61 = vmul.f32 %v492_v59, %v488_v50 }
 0x108   : > { %274 = vst [vmem:[%s191_s22] sm:$0xff] %v272_v61  ;;  %275 = vst [vmem:[%s191_s22 + $0x8] sm:$0xff] %v273_v60 }
 0x109   : > { %560 = shalt.err (!%p557_p1)
}
 0x10a   : > { %s561_s11 = scalar_lea.hbm %s798_s5, 256  ;;  %s565_s6 = scalar_lea.hbm %s845_s2, 512 }
 0x10b   : > { %p562_p3 = scmp.ne.s32.totalorder %s798_s5, %s561_s11  ;;  %p566_p2 = scmp.lt.s32.totalorder %s798_s5, %s845_s2 }
 0x10c   : > { %p567_p6 = scmp.lt.s32.totalorder %s565_s6, %s561_s11 }
 0x10d   : > { %p563_p9 = pnand %p562_p3, %p856_p12 }
 0x10e   : > { %p568_p11 = por %p567_p6, %p566_p2 }
 0x10f   : > { %p564_p0 = pneg %p563_p9 }
 0x111   : > { %p569_p13 = pnand %p568_p11, %p564_p0 }
 0x113   : > { %572 = shalt.err (!%p569_p13)
}
 0x114   : > { %s624_s23 = smov 128   ;;  %s625_s19 = smov 256  }
 0x115   : > { %s626_s22 = smov 8  }
 0x116   : > { %422 = dma.vmem_to_hbm [thread:$0]  (%p856_p12), %s800_s26, 256, %s798_s5, %s277_s20, %s624_s23, %s625_s19, %s626_s22  }
 0x117 PF: > { %s321_s29 = sand.u32 1, %s603_s12   ;;  %p857_p4 = scmp.ne.s32.totalorder %s852_s25, 0 }
 0x118   : > { %p858_p5 = scmp.ge.s32.totalorder %s615_s15, 2  ;;  %s322_s30 = scalar_lea.sflag [#allocation4], %s321_s29 }
 0x11a   : > { %p431_p7 = pnand %p858_p5, %p857_p4 }
 0x11c   : > { %p432_p8 = pneg %p431_p7 }
 0x11e   : > { %594 = dma.done.wait (%p432_p8), %s322_s30, 256  }
 0x11f   : > { %596 = vsyncadd (%p432_p8), %s322_s30, 4294967040  ;;  %s331_s16 = scalar_lea.sflag [#allocation7], %s321_s29 }
 0x120   : > { %598 = dma.done.wait (%p432_p8), %s331_s16, 16  }
 0x121   : > { %600 = vsyncadd (%p432_p8), %s331_s16, 4294967280  ;;  %p20_p12 = scmp.ge.s32.totalorder %s672_s18, 4   ;;  %s859_s12 = smov %s607_s13 }
 0x122   : > { %s860_s13 = smov %s611_s14  ;;  %s861_s14 = smov %s684_s21 }
 0x123   : > { %s862_s15 = smov %s672_s18  ;;  %22 = sbr.rel (!%p20_p12) target bundleno = 7 (0x7), region = 90 }
 0x128   :  { %335 = vsyncpa [#allocation3], 1 }
 0x129   :  { %337 = vsyncpa [#allocation3 + $0x1], 1 }
 0x12a   :  { %338 = vsyncpa [#allocation4], 1 }
 0x12b   :  { %340 = vsyncpa [#allocation4 + $0x1], 1 }
 0x12c   :  { %341 = vsyncpa [#allocation7], 1 }
 0x12d   :  { %343 = vsyncpa [#allocation7 + $0x1], 1 }

</bundles_post_ra>
